<compile_context>
chip_gen: v7x
topology: tpu7x:2x2x1
jax: 0.10.0
libtpu: 0.0.40
codegen_flags: <defaults>
</compile_context>

<pallas_src>
import math
import functools

import jax
import jax.numpy as jnp
from jax.experimental import pallas as pl
from jax.experimental.pallas import tpu as pltpu


def _build_pe(d_model: int, max_len: int) -> jnp.ndarray:
    """Deterministic sinusoidal positional-encoding table [max_len, 1, d_model]."""
    position = jnp.arange(max_len, dtype=jnp.float32)[:, None]              # [L, 1]
    div_term = jnp.exp(
        jnp.arange(0, d_model, 2, dtype=jnp.float32) * (-math.log(10000.0) / d_model)
    )                                                                        # [D/2]
    angles = position * div_term                                             # [L, D/2]
    pe = jnp.zeros((max_len, 1, d_model), dtype=jnp.float32)
    pe = pe.at[:, 0, 0::2].set(jnp.sin(angles))
    pe = pe.at[:, 0, 1::2].set(jnp.cos(angles))
    return pe


def _hash_u32(x):
    """lowbias32 integer hash — plain VPU int ops, portable to interpret mode."""
    x = x ^ (x >> jnp.uint32(16))
    x = x * jnp.uint32(0x7FEB352D)
    x = x ^ (x >> jnp.uint32(15))
    x = x * jnp.uint32(0x846CA68B)
    x = x ^ (x >> jnp.uint32(16))
    return x


def _make_pe_kernel(dropout_p: float, training: bool, ts: int, B: int, D: int):
    """Kernel: out = dropout(src + pe) on one (TS, B, D) sequence tile."""

    def kernel(seed_ref, src_ref, pe_ref, out_ref):
        # broadcast add: (TS, B, D) + (TS, 1, D); accumulate in f32
        x = src_ref[...].astype(jnp.float32) + pe_ref[...]

        if training and dropout_p > 0.0:
            # Counter-based inverted dropout: a unique per-element counter over
            # the whole [S, B, D] tensor is hashed together with the seed.
            # TODO(synk): PyTorch's dropout RNG stream cannot be reproduced
            # bit-exactly; this mask is statistically equivalent.
            seed = seed_ref[0].astype(jnp.uint32) * jnp.uint32(0x9E3779B9)
            row = jax.lax.broadcasted_iota(jnp.int32, x.shape, 0)
            col = jax.lax.broadcasted_iota(jnp.int32, x.shape, 1)
            lane = jax.lax.broadcasted_iota(jnp.int32, x.shape, 2)
            g_row = pl.program_id(0) * ts + row            # global seq row
            counter = ((g_row * B + col) * D + lane).astype(jnp.uint32)
            bits = _hash_u32(counter ^ seed)
            # compare in 24-bit signed space (robust lowering everywhere)
            bits24 = (bits >> jnp.uint32(8)).astype(jnp.int32)     # [0, 2^24)
            thresh = jnp.int32(min(int(dropout_p * float(1 << 24)), (1 << 24) - 1))
            keep = bits24 >= thresh
            x = jnp.where(keep, x * (1.0 / (1.0 - dropout_p)), 0.0)

        out_ref[...] = x.astype(out_ref.dtype)

    return kernel


def _choose_ts(S: int, B: int, D: int, itemsize: int,
               target_bytes: int = 2 * 1024 * 1024) -> int:
    """Sequence-tile length: ~2 MiB per buffer, multiple of 8, >=2 grid steps."""
    rows = max(8, target_bytes // max(1, B * D * itemsize))
    ts = min(S, rows)
    ts = max(8, (ts // 8) * 8)
    if S >= 16:
        # keep grid length >= 2 so v7x can shard over its 2 TensorCores
        half = max(8, (((S + 1) // 2 + 7) // 8) * 8)
        ts = min(ts, half)
    return int(ts)


@functools.partial(jax.jit, static_argnames=("dropout_p", "training"))
def positional_encoding(src, pe, seed, *, dropout_p: float = 0.1,
                        training: bool = False):
    """src: [S, B, D]; pe: [max_len, 1, D] float32; seed: int32[1]."""
    S, B, D = src.shape
    max_len = pe.shape[0]
    assert S <= max_len, f"seq_len {S} exceeds positional table max_len {max_len}"

    ts = _choose_ts(S, B, D, jnp.dtype(src.dtype).itemsize)
    grid = (pl.cdiv(S, ts),)
    kernel = _make_pe_kernel(dropout_p, training, ts, B, D)

    grid_spec = pltpu.PrefetchScalarGridSpec(
        num_scalar_prefetch=1,                                  # seed -> SMEM
        grid=grid,
        in_specs=[
            pl.BlockSpec((ts, B, D), lambda i, seed: (i, 0, 0)),   # src tile i
            pl.BlockSpec((ts, 1, D), lambda i, seed: (i, 0, 0)),   # pe  tile i
        ],
        out_specs=pl.BlockSpec((ts, B, D), lambda i, seed: (i, 0, 0)),
    )
    return pl.pallas_call(
        kernel,
        out_shape=jax.ShapeDtypeStruct((S, B, D), src.dtype),
        grid_spec=grid_spec,
        compiler_params=pltpu.CompilerParams(
            dimension_semantics=("parallel",),
            vmem_limit_bytes=32 * 1024 * 1024,   # safe on v5e/v6e, < v7x 64 MiB
        ),
    )(seed, src, pe)


if __name__ == "__main__":
    seq_len, batch, d_model, max_len = 8, 2, 32, 64
    dropout_p = 0.1

    key = jax.random.PRNGKey(0)
    src = jax.random.normal(key, (seq_len, batch, d_model), dtype=jnp.float32)
    pe = _build_pe(d_model, max_len)
    seed = jnp.array([0], dtype=jnp.int32)

    # Eval-mode forward (dropout is identity), matches PyTorch .eval() exactly.
    out = positional_encoding(src, pe, seed, dropout_p=dropout_p, training=False)
    out = jax.block_until_ready(out)

    ref = src + pe[:seq_len]
    assert jnp.allclose(out, ref, atol=1e-6), "mismatch vs reference (eval mode)"

    # Training-mode forward (in-kernel hash-PRNG inverted dropout).
    out_train = positional_encoding(src, pe, seed, dropout_p=dropout_p, training=True)
    out_train = jax.block_until_ready(out_train)

    # Semantic check: every element is either dropped (0) or ref/(1-p).
    scaled = ref / (1.0 - dropout_p)
    ok = jnp.isclose(out_train, 0.0, atol=1e-7) | jnp.isclose(out_train, scaled, atol=1e-5)
    assert bool(jnp.all(ok)), "training-mode dropout values inconsistent"

    print("KERNEL_OK")
</pallas_src>

<mosaic_0001>
module attributes {stable_mosaic.version = 11 : i64} {
  func.func @kernel(%arg0: i32, %arg1: memref<1xi32, #tpu.memory_space<smem>>, %arg2: memref<8x2x32xf32, #tpu.memory_space<vmem>>, %arg3: memref<8x1x32xf32, #tpu.memory_space<vmem>>, %arg4: memref<8x2x32xf32, #tpu.memory_space<vmem>>) attributes {dimension_semantics = [#tpu.dimension_semantics<parallel>], iteration_bounds = array<i64: 1>, scalar_prefetch = 1 : i64, scratch_operands = 0 : i64, tpu.core_type = #tpu.core_type<tc>, window_params = [{transform_indices = @transform_0, window_bounds = array<i64: 8, 2, 32>}, {transform_indices = @transform_1, window_bounds = array<i64: 8, 1, 32>}, {transform_indices = @transform_2, window_bounds = array<i64: 8, 2, 32>}]} {
    %c0 = arith.constant 0 : index
    %c0_0 = arith.constant 0 : index
    %c0_1 = arith.constant 0 : index
    %0 = vector.load %arg2[%c0, %c0_0, %c0_1] : memref<8x2x32xf32, #tpu.memory_space<vmem>>, vector<8x2x32xf32>
    %c0_2 = arith.constant 0 : index
    %c0_3 = arith.constant 0 : index
    %c0_4 = arith.constant 0 : index
    %1 = vector.load %arg3[%c0_2, %c0_3, %c0_4] : memref<8x1x32xf32, #tpu.memory_space<vmem>>, vector<8x1x32xf32>
    %2 = vector.broadcast %1 : vector<8x1x32xf32> to vector<8x2x32xf32>
    %3 = arith.addf %0, %2 : vector<8x2x32xf32>
    %c0_5 = arith.constant 0 : index
    %c0_6 = arith.constant 0 : index
    %c0_7 = arith.constant 0 : index
    %4 = vector.load %arg4[%c0_5, %c0_6, %c0_7] : memref<8x2x32xf32, #tpu.memory_space<vmem>>, vector<8x2x32xf32>
    tpu.vector_store %arg4[%c0_5, %c0_6, %c0_7], %3 {strides = array<i32>} : memref<8x2x32xf32, #tpu.memory_space<vmem>>, vector<8x2x32xf32>,
    return
  }
  func.func @transform_0(%arg0: i32, %arg1: memref<1xi32, #tpu.memory_space<smem>>) -> (i32, i32, i32) {
    %c0_i32 = arith.constant 0 : i32
    %c0_i32_0 = arith.constant 0 : i32
    %c0_i32_1 = arith.constant 0 : i32
    return %arg0, %c0_i32, %c0_i32_0 : i32, i32, i32
  }
  func.func @transform_1(%arg0: i32, %arg1: memref<1xi32, #tpu.memory_space<smem>>) -> (i32, i32, i32) {
    %c0_i32 = arith.constant 0 : i32
    %c0_i32_0 = arith.constant 0 : i32
    %c0_i32_1 = arith.constant 0 : i32
    return %arg0, %c0_i32, %c0_i32_0 : i32, i32, i32
  }
  func.func @transform_2(%arg0: i32, %arg1: memref<1xi32, #tpu.memory_space<smem>>) -> (i32, i32, i32) {
    %c0_i32 = arith.constant 0 : i32
    %c0_i32_0 = arith.constant 0 : i32
    %c0_i32_1 = arith.constant 0 : i32
    return %arg0, %c0_i32, %c0_i32_0 : i32, i32, i32
  }
}

</mosaic_0001>

<bundles_post_ra>
// kernel: positional_encoding.1
= control target key start
LH: loop header
LB: loop body
LE: loop exit
PB: predicated region body
PF: predicated region fallthrough
CT: control target
= control target key end

     0   :  { %vm86_vm0 = vcmask 254976   ;;  %s237_s0 = inlined_call_operand.<no memory space> [shape: s32[1], index: 0, kind: input, shape index: {}]   ;;  %s238_s1 = inlined_call_operand.vmem [shape: f32[8,2,32], index: 1, kind: input, shape index: {}]   ;;  %s239_s2 = inlined_call_operand.vmem [shape: f32[64,1,32], index: 2, kind: input, shape index: {}]   ;;  %s240_s3 = inlined_call_operand.hbm [shape: f32[8,2,32], index: 3, kind: output, shape index: {}]  }
   0x1   :  { %v14_v0 = vld [vmem:[%s238_s1] sm:$0x3]  ;;  %v15_v3 = vld [vmem:[%s238_s1 + $0x2] sm:$0x3]  ;;  %v16_v5 = vld [vmem:[%s238_s1 + $0x4] sm:$0x3] }
   0x2   :  { %v111_v1 = vld [vmem:[%s239_s2] ss:$0 sm:$0xff]  ;;  %v112_v4 = vld [vmem:[%s239_s2 + $0x1] ss:$0 sm:$0xff]  ;;  %v113_v7 = vld [vmem:[%s239_s2 + $0x2] ss:$0 sm:$0xff] }
   0x3   :  { %v78_v2 = vadd.f32 %v111_v1, %v14_v0  ;;  %v79_v6 = vadd.f32 %v112_v4, %v15_v3  ;;  %v17_v8 = vld [vmem:[%s238_s1 + $0x6] sm:$0x3]  ;;  %v114_v9 = vld [vmem:[%s239_s2 + $0x3] ss:$0 sm:$0xff]  ;;  %v80_v10 = vadd.f32 %v113_v7, %v16_v5  ;;  %v18_v12 = vld [vmem:[%s238_s1 + $0x8] sm:$0x3] }
   0x4   :  { %v81_v11 = vadd.f32 %v114_v9, %v17_v8  ;;  %v115_v13 = vld [vmem:[%s239_s2 + $0x4] ss:$0 sm:$0xff]  ;;  %v19_v14 = vld [vmem:[%s238_s1 + $0xa] sm:$0x3]  ;;  %v116_v16 = vld [vmem:[%s239_s2 + $0x5] ss:$0 sm:$0xff] }
   0x5   :  { %87 = vst.msk [vmem:[#allocation4] sm:$0x3] %vm86_vm0, %v78_v2  ;;  %88 = vst.msk [vmem:[#allocation4 + $0x2] sm:$0x3] %vm86_vm0, %v79_v6  ;;  %v82_v15 = vadd.f32 %v115_v13, %v18_v12  ;;  %v20_v17 = vld [vmem:[%s238_s1 + $0xc] sm:$0x3]  ;;  %v83_v19 = vadd.f32 %v116_v16, %v19_v14 }
   0x6   :  { %v117_v18 = vld [vmem:[%s239_s2 + $0x6] ss:$0 sm:$0xff]  ;;  %89 = vst.msk [vmem:[#allocation4 + $0x4] sm:$0x3] %vm86_vm0, %v80_v10  ;;  %90 = vst.msk [vmem:[#allocation4 + $0x6] sm:$0x3] %vm86_vm0, %v81_v11 }
   0x7   :  { %v84_v20 = vadd.f32 %v117_v18, %v20_v17  ;;  %v21_v21 = vld [vmem:[%s238_s1 + $0xe] sm:$0x3]  ;;  %v118_v22 = vld [vmem:[%s239_s2 + $0x7] ss:$0 sm:$0xff] }
   0x8   :  { %9 = vsyncpa [#allocation5], 0  ;;  %91 = vst.msk [vmem:[#allocation4 + $0x8] sm:$0x3] %vm86_vm0, %v82_v15  ;;  %v85_v23 = vadd.f32 %v118_v22, %v21_v21  ;;  %s146_s0 = smov [#allocation4]  }
   0x9   :  { %s100_s16 = sshll.u32 %s146_s0, 4  ;;  %92 = vst.msk [vmem:[#allocation4 + $0xa] sm:$0x3] %vm86_vm0, %v83_v19  ;;  %93 = vst.msk [vmem:[#allocation4 + $0xc] sm:$0x3] %vm86_vm0, %v84_v20  ;;  %s101_s16 = int_to_ptr.vmem [resolvable:$true] %s100_s16 }
   0xa   :  { %94 = vst.msk [vmem:[#allocation4 + $0xe] sm:$0x3] %vm86_vm0, %v85_v23  ;;  %s122_s17 = scalar_lea.vmem %s101_s16, 256  ;;  %p127_p1 = scmp.lt.s32.totalorder %s101_s16, %s101_s16 }
   0xb   :  { %p123_p0 = scmp.ne.s32.totalorder %s101_s16, %s122_s17  ;;  %p128_p2 = scmp.lt.s32.totalorder %s122_s17, %s122_s17 }
   0xd   :  { %p129_p3 = por %p128_p2, %p127_p1 }
   0xf   :  { %p130_p4 = pnand %p129_p3, %p123_p0 }
  0x11   :  { %133 = shalt.err (!%p130_p4)
}
  0x12   :  { %s134_s18 = scalar_lea.hbm %s240_s3, 256 }
  0x13   :  { %p135_p5 = scmp.ne.s32.totalorder %s240_s3, %s134_s18  ;;  %p138_p6 = scmp.lt.u32.totalorder %s134_s18, %s240_s3 }
  0x15   :  { %p140_p7 = pnand %p138_p6, %p135_p5 }
  0x17   :  { %143 = shalt.err (!%p140_p7)
}
  0x18   :  { %s147_s23 = smov 32   ;;  %s148_s24 = smov 2  }
  0x19   :  { %106 = dma.vmem_to_hbm [thread:$0]  %s101_s16, 256, %s240_s3, [#allocation5], %s147_s23, %s147_s23, %s148_s24  }
  0x1a   :  { %144 = dma.done.wait [#allocation5], 256  }
  0x1b   :  { %145 = vsyncadd [#allocation5], 4294967040 }
  0x1c   :  { %110 = vsyncpa [#allocation5], 1 }

</bundles_post_ra>
